<compile_context>
chip_gen: v6e
topology: v6e:2x2x1
jax: 0.10.0
libtpu: 0.0.40
codegen_flags: <defaults>
</compile_context>

<pallas_src>
import numpy as np
import jax
import jax.numpy as jnp
from jax.experimental import pallas as pl
from jax.experimental.pallas import tpu as pltpu

EPS = 1e-5                      # nn.BatchNorm2d default eps
INV_SQRT2 = 0.7071067811865476
COMPUTE_DTYPE = jnp.bfloat16    # conv GEMM operand dtype (accumulation / stats stay f32)


def _gelu_exact(v):
    # F.gelu default: exact erf formulation (computed in f32).
    return 0.5 * v * (1.0 + jax.lax.erf(v * INV_SQRT2))


# -----------------------------------------------------------------------------
# Fused kernel: conv1 -> BN1 -> gelu -> conv2 -> BN2 -> gelu -> + x
# -----------------------------------------------------------------------------
def _make_fused_kernel(N, H, W, C, k1, k2):
    WC = W * C
    NH = N * H
    p1 = (k1 - 1) // 2
    p2 = (k2 - 1) // 2

    def kernel(x_ref, w1_ref, w2_ref, bn_ref, gm_ref, out_ref, xp_ref, hp_ref):
        f32 = jnp.float32
        x = x_ref[...]                                           # (NH, WC) f32

        # ---- conv 5x5: H-padding via zeroed VMEM scratch; W-padding is folded
        #      into the block-Toeplitz weights, so every dot is 128-lane dense.
        xp_ref[...] = jnp.zeros_like(xp_ref)
        xp_ref[:, p1:p1 + H, :] = x.reshape(N, H, WC)
        y1 = jnp.zeros((NH, WC), f32)
        for dh in range(k1):                                      # static unroll
            xs = xp_ref[:, dh:dh + H, :].reshape(NH, WC).astype(COMPUTE_DTYPE)
            y1 = y1 + jnp.dot(xs, w1_ref[dh], preferred_element_type=f32)

        # ---- BN1 (training-mode batch stats) + GELU
        #      gm = channel-grouping matrix / (N*H*W): one sublane reduce plus a
        #      tiny matmul gives per-channel mean / E[y^2] broadcast over lanes.
        s = jnp.sum(y1, axis=0, keepdims=True)                    # (1, WC)
        q = jnp.sum(y1 * y1, axis=0, keepdims=True)
        mean = jnp.dot(s, gm_ref[...], preferred_element_type=f32)
        var = jnp.dot(q, gm_ref[...], preferred_element_type=f32) - mean * mean
        a = bn_ref[0:1, :] * jax.lax.rsqrt(var + EPS)
        b = bn_ref[1:2, :] - mean * a
        h = _gelu_exact(y1 * a + b)                               # (NH, WC) f32

        # ---- conv 3x3
        hp_ref[...] = jnp.zeros_like(hp_ref)
        hp_ref[:, p2:p2 + H, :] = h.reshape(N, H, WC)
        y2 = jnp.zeros((NH, WC), f32)
        for dh in range(k2):
            hs = hp_ref[:, dh:dh + H, :].reshape(NH, WC).astype(COMPUTE_DTYPE)
            y2 = y2 + jnp.dot(hs, w2_ref[dh], preferred_element_type=f32)

        # ---- BN2 + GELU + residual
        s2 = jnp.sum(y2, axis=0, keepdims=True)
        q2 = jnp.sum(y2 * y2, axis=0, keepdims=True)
        mean2 = jnp.dot(s2, gm_ref[...], preferred_element_type=f32)
        var2 = jnp.dot(q2, gm_ref[...], preferred_element_type=f32) - mean2 * mean2
        a2 = bn_ref[2:3, :] * jax.lax.rsqrt(var2 + EPS)
        b2 = bn_ref[3:4, :] - mean2 * a2
        out_ref[...] = _gelu_exact(y2 * a2 + b2) + x

    return kernel


# -----------------------------------------------------------------------------
# Wrapper-side weight preprocessing
# -----------------------------------------------------------------------------
def _toeplitz_weight(w_oihw, W):
    """PyTorch conv weight (O, I, kh, kw) -> (kh, W*I, W*O) block-Toeplitz weights.

    BigW[dh][ww*I + i, w*O + o] = w[o, i, dh, ww - w + pad] when the tap is in
    range, else 0 — i.e. the kw taps, the C_in contraction and the 'SAME'
    W-padding are all folded into a lane-dense (W*I, W*O) GEMM operand.
    """
    O, I, kh, kw = w_oihw.shape
    pad = (kw - 1) // 2
    # S[dw, ww, w] = 1 iff ww == w + dw - pad   (compile-time numpy constant)
    S = np.stack([np.eye(W, W, k=pad - dw, dtype=np.float32) for dw in range(kw)])
    Kt = jnp.transpose(w_oihw, (2, 3, 1, 0))            # (kh, kw, I, O)
    big = jnp.einsum('duv,hdio->huivo', S, Kt)           # (kh, W, I, W, O)
    return big.reshape(kh, W * I, W * O)


def _channel_mean_matrix(N, H, W, C):
    """Constant (W*C, W*C) matrix G/M with G[l, l'] = 1 iff l % C == l' % C.

    (row_sums @ G/M) gives the per-channel batch mean already broadcast across
    the lane dimension (lane index = w*C + c)."""
    WC = W * C
    lane = np.arange(WC)
    G = (lane[:, None] % C == lane[None, :] % C).astype(np.float32)
    return jnp.asarray(G / float(N * H * W))


@jax.jit
def deterministic_forward(x_nchw, params):
    N, C, H, W = x_nchw.shape
    WC, NH = W * C, N * H
    k1 = params["w1"].shape[-1]
    k2 = params["w2"].shape[-1]
    p1, p2 = (k1 - 1) // 2, (k2 - 1) // 2

    x_rows = jnp.transpose(x_nchw, (0, 2, 3, 1)).reshape(NH, WC).astype(jnp.float32)
    w1_big = _toeplitz_weight(params["w1"], W).astype(COMPUTE_DTYPE)   # (k1, WC, WC)
    w2_big = _toeplitz_weight(params["w2"], W).astype(COMPUTE_DTYPE)   # (k2, WC, WC)
    # NOTE: conv biases b1/b2 are intentionally NOT passed to the kernel —
    # training-mode BatchNorm re-centers immediately, so they cancel exactly.
    bn = jnp.concatenate([
        jnp.tile(params["g1"].reshape(1, C), (1, W)),
        jnp.tile(params["be1"].reshape(1, C), (1, W)),
        jnp.tile(params["g2"].reshape(1, C), (1, W)),
        jnp.tile(params["be2"].reshape(1, C), (1, W)),
    ], axis=0).astype(jnp.float32)                                     # (4, WC)
    gm = _channel_mean_matrix(N, H, W, C)                              # (WC, WC)

    kernel = _make_fused_kernel(N, H, W, C, k1, k2)
    out_rows = pl.pallas_call(
        kernel,
        grid=(1,),
        in_specs=[
            pl.BlockSpec((NH, WC), lambda i: (0, 0)),
            pl.BlockSpec((k1, WC, WC), lambda i: (0, 0, 0)),
            pl.BlockSpec((k2, WC, WC), lambda i: (0, 0, 0)),
            pl.BlockSpec((4, WC), lambda i: (0, 0)),
            pl.BlockSpec((WC, WC), lambda i: (0, 0)),
        ],
        out_specs=pl.BlockSpec((NH, WC), lambda i: (0, 0)),
        out_shape=jax.ShapeDtypeStruct((NH, WC), jnp.float32),
        scratch_shapes=[
            pltpu.VMEM((N, H + 2 * p1, WC), jnp.float32),   # H-padded conv1 input
            pltpu.VMEM((N, H + 2 * p2, WC), jnp.float32),   # H-padded conv2 input
        ],
        compiler_params=pltpu.CompilerParams(
            dimension_semantics=("arbitrary",)),
    )(x_rows, w1_big, w2_big, bn, gm)

    # At larger batch one would tile the batch axis "parallel" (per-image partial
    # stats reduced afterwards) to use both v7x TensorCores; at N=2 the single
    # fused launch dominates.
    return jnp.transpose(out_rows.reshape(N, H, W, C), (0, 3, 1, 2))


# -----------------------------------------------------------------------------
# Pure-JAX f32 reference (NCHW, matching PyTorch semantics, biases included)
# -----------------------------------------------------------------------------
def reference_forward(x_nchw, params):
    def conv(x, w, b):
        y = jax.lax.conv_general_dilated(
            x, w, window_strides=(1, 1), padding="SAME",
            dimension_numbers=("NCHW", "OIHW", "NCHW"))
        return y + b.reshape(1, -1, 1, 1)

    def bn(y, g, be):
        mean = jnp.mean(y, axis=(0, 2, 3), keepdims=True)
        var = jnp.mean((y - mean) ** 2, axis=(0, 2, 3), keepdims=True)
        return ((y - mean) / jnp.sqrt(var + EPS)) * g.reshape(1, -1, 1, 1) \
               + be.reshape(1, -1, 1, 1)

    h = _gelu_exact(bn(conv(x_nchw, params["w1"], params["b1"].reshape(-1)),
                       params["g1"].reshape(-1), params["be1"].reshape(-1)))
    out = _gelu_exact(bn(conv(h, params["w2"], params["b2"].reshape(-1)),
                         params["g2"].reshape(-1), params["be2"].reshape(-1)))
    return out + x_nchw


if __name__ == "__main__":
    # Residual requires in_dim == out_dim; W*C = 128 makes the row layout lane-dense.
    N, C, H, W = 2, 8, 16, 16
    key = jax.random.PRNGKey(0)
    ks = jax.random.split(key, 9)
    params = {
        "w1": 0.1 * jax.random.normal(ks[0], (C, C, 5, 5), jnp.float32),
        "b1": 0.1 * jax.random.normal(ks[1], (1, C), jnp.float32),
        "g1": 1.0 + 0.1 * jax.random.normal(ks[2], (1, C), jnp.float32),
        "be1": 0.1 * jax.random.normal(ks[3], (1, C), jnp.float32),
        "w2": 0.1 * jax.random.normal(ks[4], (C, C, 3, 3), jnp.float32),
        "b2": 0.1 * jax.random.normal(ks[5], (1, C), jnp.float32),
        "g2": 1.0 + 0.1 * jax.random.normal(ks[6], (1, C), jnp.float32),
        "be2": 0.1 * jax.random.normal(ks[7], (1, C), jnp.float32),
    }
    x = jax.random.normal(ks[8], (N, C, H, W), jnp.float32)

    out = jax.block_until_ready(deterministic_forward(x, params))
    ref = jax.block_until_ready(reference_forward(x, params))
    assert out.shape == x.shape
    max_err = float(jnp.max(jnp.abs(out - ref)))
    # Tolerance accounts for bf16 conv GEMM operands (f32 accumulation / BN stats).
    if not jnp.allclose(out, ref, atol=3e-2, rtol=3e-2):
        raise AssertionError(f"kernel/reference mismatch, max abs err {max_err}")
    # TODO(synk): BatchNorm running_mean/running_var momentum updates are
    # training-only bookkeeping and do not affect the forward output; omitted.
    print("KERNEL_OK")
</pallas_src>

<mosaic_0001>
module attributes {stable_mosaic.version = 11 : i64} {
  func.func @kernel(%arg0: i32, %arg1: memref<32x128xf32, #tpu.memory_space<vmem>>, %arg2: memref<5x128x128xbf16, #tpu.memory_space<vmem>>, %arg3: memref<3x128x128xbf16, #tpu.memory_space<vmem>>, %arg4: memref<4x128xf32, #tpu.memory_space<vmem>>, %arg5: memref<128x128xf32, #tpu.memory_space<vmem>>, %arg6: memref<32x128xf32, #tpu.memory_space<vmem>>, %arg7: memref<2x20x128xf32, #tpu.memory_space<vmem>>, %arg8: memref<2x18x128xf32, #tpu.memory_space<vmem>>) attributes {dimension_semantics = [#tpu.dimension_semantics<arbitrary>], iteration_bounds = array<i64: 1>, scalar_prefetch = 0 : i64, scratch_operands = 2 : i64, tpu.core_type = #tpu.core_type<tc>, window_params = [{pipeline_mode = #tpu.pipeline_mode<synchronous>, transform_indices = @transform_0, window_bounds = array<i64: 32, 128>}, {pipeline_mode = #tpu.pipeline_mode<synchronous>, transform_indices = @transform_1, window_bounds = array<i64: 5, 128, 128>}, {pipeline_mode = #tpu.pipeline_mode<synchronous>, transform_indices = @transform_2, window_bounds = array<i64: 3, 128, 128>}, {pipeline_mode = #tpu.pipeline_mode<synchronous>, transform_indices = @transform_3, window_bounds = array<i64: 4, 128>}, {pipeline_mode = #tpu.pipeline_mode<synchronous>, transform_indices = @transform_4, window_bounds = array<i64: 128, 128>}, {pipeline_mode = #tpu.pipeline_mode<synchronous>, transform_indices = @transform_5, window_bounds = array<i64: 32, 128>}]} {
    %c0 = arith.constant 0 : index
    %c0_0 = arith.constant 0 : index
    %0 = vector.load %arg1[%c0, %c0_0] : memref<32x128xf32, #tpu.memory_space<vmem>>, vector<32x128xf32>
    %cst = arith.constant 0.000000e+00 : f32
    %1 = vector.broadcast %cst : f32 to vector<2x20x128xf32>
    %c0_1 = arith.constant 0 : index
    %c0_2 = arith.constant 0 : index
    %c0_3 = arith.constant 0 : index
    %2 = vector.load %arg7[%c0_1, %c0_2, %c0_3] : memref<2x20x128xf32, #tpu.memory_space<vmem>>, vector<2x20x128xf32>
    tpu.vector_store %arg7[%c0_1, %c0_2, %c0_3], %1 {strides = array<i32>} : memref<2x20x128xf32, #tpu.memory_space<vmem>>, vector<2x20x128xf32>,
    %3 = vector.shape_cast %0 : vector<32x128xf32> to vector<2x16x128xf32>
    %c0_4 = arith.constant 0 : index
    %c2 = arith.constant 2 : index
    %c0_5 = arith.constant 0 : index
    %4 = vector.load %arg7[%c0_4, %c2, %c0_5] : memref<2x20x128xf32, #tpu.memory_space<vmem>>, vector<2x16x128xf32>
    tpu.vector_store %arg7[%c0_4, %c2, %c0_5], %3 {strides = array<i32>} : memref<2x20x128xf32, #tpu.memory_space<vmem>>, vector<2x16x128xf32>,
    %cst_6 = arith.constant 0.000000e+00 : f32
    %5 = vector.broadcast %cst_6 : f32 to vector<32x128xf32>
    %c0_7 = arith.constant 0 : index
    %c0_8 = arith.constant 0 : index
    %c0_9 = arith.constant 0 : index
    %6 = vector.load %arg7[%c0_7, %c0_8, %c0_9] : memref<2x20x128xf32, #tpu.memory_space<vmem>>, vector<2x16x128xf32>
    %7 = vector.shape_cast %6 : vector<2x16x128xf32> to vector<32x128xf32>
    %8 = arith.truncf %7 : vector<32x128xf32> to vector<32x128xbf16>
    %c0_10 = arith.constant 0 : index
    %c0_11 = arith.constant 0 : index
    %c0_12 = arith.constant 0 : index
    %9 = vector.load %arg2[%c0_10, %c0_11, %c0_12] : memref<5x128x128xbf16, #tpu.memory_space<vmem>>, vector<1x128x128xbf16>
    %10 = vector.shape_cast %9 : vector<1x128x128xbf16> to vector<128x128xbf16>
    %cst_13 = arith.constant dense<0.000000e+00> : vector<32x128xf32>
    %11 = tpu.matmul %8, %10, %cst_13 {dimension_numbers = #tpu.dot_dimension_numbers<[1], [0], [0], [1], [0, 0, 1, 1], [], []>} : vector<32x128xbf16>, vector<128x128xbf16>, vector<32x128xf32> -> vector<32x128xf32>
    %12 = arith.addf %5, %11 : vector<32x128xf32>
    %c0_14 = arith.constant 0 : index
    %c1 = arith.constant 1 : index
    %c0_15 = arith.constant 0 : index
    %13 = vector.load %arg7[%c0_14, %c1, %c0_15] : memref<2x20x128xf32, #tpu.memory_space<vmem>>, vector<2x16x128xf32>
    %14 = vector.shape_cast %13 : vector<2x16x128xf32> to vector<32x128xf32>
    %15 = arith.truncf %14 : vector<32x128xf32> to vector<32x128xbf16>
    %c1_16 = arith.constant 1 : index
    %c0_17 = arith.constant 0 : index
    %c0_18 = arith.constant 0 : index
    %16 = vector.load %arg2[%c1_16, %c0_17, %c0_18] : memref<5x128x128xbf16, #tpu.memory_space<vmem>>, vector<1x128x128xbf16>
    %17 = vector.shape_cast %16 : vector<1x128x128xbf16> to vector<128x128xbf16>
    %cst_19 = arith.constant dense<0.000000e+00> : vector<32x128xf32>
    %18 = tpu.matmul %15, %17, %cst_19 {dimension_numbers = #tpu.dot_dimension_numbers<[1], [0], [0], [1], [0, 0, 1, 1], [], []>} : vector<32x128xbf16>, vector<128x128xbf16>, vector<32x128xf32> -> vector<32x128xf32>
    %19 = arith.addf %12, %18 : vector<32x128xf32>
    %c0_20 = arith.constant 0 : index
    %c2_21 = arith.constant 2 : index
    %c0_22 = arith.constant 0 : index
    %20 = vector.load %arg7[%c0_20, %c2_21, %c0_22] : memref<2x20x128xf32, #tpu.memory_space<vmem>>, vector<2x16x128xf32>
    %21 = vector.shape_cast %20 : vector<2x16x128xf32> to vector<32x128xf32>
    %22 = arith.truncf %21 : vector<32x128xf32> to vector<32x128xbf16>
    %c2_23 = arith.constant 2 : index
    %c0_24 = arith.constant 0 : index
    %c0_25 = arith.constant 0 : index
    %23 = vector.load %arg2[%c2_23, %c0_24, %c0_25] : memref<5x128x128xbf16, #tpu.memory_space<vmem>>, vector<1x128x128xbf16>
    %24 = vector.shape_cast %23 : vector<1x128x128xbf16> to vector<128x128xbf16>
    %cst_26 = arith.constant dense<0.000000e+00> : vector<32x128xf32>
    %25 = tpu.matmul %22, %24, %cst_26 {dimension_numbers = #tpu.dot_dimension_numbers<[1], [0], [0], [1], [0, 0, 1, 1], [], []>} : vector<32x128xbf16>, vector<128x128xbf16>, vector<32x128xf32> -> vector<32x128xf32>
    %26 = arith.addf %19, %25 : vector<32x128xf32>
    %c0_27 = arith.constant 0 : index
    %c3 = arith.constant 3 : index
    %c0_28 = arith.constant 0 : index
    %27 = vector.load %arg7[%c0_27, %c3, %c0_28] : memref<2x20x128xf32, #tpu.memory_space<vmem>>, vector<2x16x128xf32>
    %28 = vector.shape_cast %27 : vector<2x16x128xf32> to vector<32x128xf32>
    %29 = arith.truncf %28 : vector<32x128xf32> to vector<32x128xbf16>
    %c3_29 = arith.constant 3 : index
    %c0_30 = arith.constant 0 : index
    %c0_31 = arith.constant 0 : index
    %30 = vector.load %arg2[%c3_29, %c0_30, %c0_31] : memref<5x128x128xbf16, #tpu.memory_space<vmem>>, vector<1x128x128xbf16>
    %31 = vector.shape_cast %30 : vector<1x128x128xbf16> to vector<128x128xbf16>
    %cst_32 = arith.constant dense<0.000000e+00> : vector<32x128xf32>
    %32 = tpu.matmul %29, %31, %cst_32 {dimension_numbers = #tpu.dot_dimension_numbers<[1], [0], [0], [1], [0, 0, 1, 1], [], []>} : vector<32x128xbf16>, vector<128x128xbf16>, vector<32x128xf32> -> vector<32x128xf32>
    %33 = arith.addf %26, %32 : vector<32x128xf32>
    %c0_33 = arith.constant 0 : index
    %c4 = arith.constant 4 : index
    %c0_34 = arith.constant 0 : index
    %34 = vector.load %arg7[%c0_33, %c4, %c0_34] : memref<2x20x128xf32, #tpu.memory_space<vmem>>, vector<2x16x128xf32>
    %35 = vector.shape_cast %34 : vector<2x16x128xf32> to vector<32x128xf32>
    %36 = arith.truncf %35 : vector<32x128xf32> to vector<32x128xbf16>
    %c4_35 = arith.constant 4 : index
    %c0_36 = arith.constant 0 : index
    %c0_37 = arith.constant 0 : index
    %37 = vector.load %arg2[%c4_35, %c0_36, %c0_37] : memref<5x128x128xbf16, #tpu.memory_space<vmem>>, vector<1x128x128xbf16>
    %38 = vector.shape_cast %37 : vector<1x128x128xbf16> to vector<128x128xbf16>
    %cst_38 = arith.constant dense<0.000000e+00> : vector<32x128xf32>
    %39 = tpu.matmul %36, %38, %cst_38 {dimension_numbers = #tpu.dot_dimension_numbers<[1], [0], [0], [1], [0, 0, 1, 1], [], []>} : vector<32x128xbf16>, vector<128x128xbf16>, vector<32x128xf32> -> vector<32x128xf32>
    %40 = arith.addf %33, %39 : vector<32x128xf32>
    %cst_39 = arith.constant dense<0.000000e+00> : vector<128xf32>
    %41 = vector.multi_reduction <add>, %40, %cst_39 [0] : vector<32x128xf32> to vector<128xf32>
    %42 = vector.shape_cast %41 : vector<128xf32> to vector<1x128xf32>
    %43 = arith.mulf %40, %40 : vector<32x128xf32>
    %cst_40 = arith.constant dense<0.000000e+00> : vector<128xf32>
    %44 = vector.multi_reduction <add>, %43, %cst_40 [0] : vector<32x128xf32> to vector<128xf32>
    %45 = vector.shape_cast %44 : vector<128xf32> to vector<1x128xf32>
    %c0_41 = arith.constant 0 : index
    %c0_42 = arith.constant 0 : index
    %46 = vector.load %arg5[%c0_41, %c0_42] : memref<128x128xf32, #tpu.memory_space<vmem>>, vector<128x128xf32>
    %cst_43 = arith.constant dense<0.000000e+00> : vector<1x128xf32>
    %47 = tpu.matmul %42, %46, %cst_43 {dimension_numbers = #tpu.dot_dimension_numbers<[1], [0], [0], [1], [0, 0, 1, 1], [], []>} : vector<1x128xf32>, vector<128x128xf32>, vector<1x128xf32> -> vector<1x128xf32>
    %c0_44 = arith.constant 0 : index
    %c0_45 = arith.constant 0 : index
    %48 = vector.load %arg5[%c0_44, %c0_45] : memref<128x128xf32, #tpu.memory_space<vmem>>, vector<128x128xf32>
    %cst_46 = arith.constant dense<0.000000e+00> : vector<1x128xf32>
    %49 = tpu.matmul %45, %48, %cst_46 {dimension_numbers = #tpu.dot_dimension_numbers<[1], [0], [0], [1], [0, 0, 1, 1], [], []>} : vector<1x128xf32>, vector<128x128xf32>, vector<1x128xf32> -> vector<1x128xf32>
    %50 = arith.mulf %47, %47 : vector<1x128xf32>
    %51 = arith.subf %49, %50 : vector<1x128xf32>
    %c0_47 = arith.constant 0 : index
    %c0_48 = arith.constant 0 : index
    %52 = vector.load %arg4[%c0_47, %c0_48] : memref<4x128xf32, #tpu.memory_space<vmem>>, vector<1x128xf32>
    %cst_49 = arith.constant 9.99999974E-6 : f32
    %53 = vector.broadcast %cst_49 : f32 to vector<1x128xf32>
    %54 = arith.addf %51, %53 : vector<1x128xf32>
    %55 = math.rsqrt %54 : vector<1x128xf32>
    %56 = arith.mulf %52, %55 : vector<1x128xf32>
    %c1_50 = arith.constant 1 : index
    %c0_51 = arith.constant 0 : index
    %57 = vector.load %arg4[%c1_50, %c0_51] : memref<4x128xf32, #tpu.memory_space<vmem>>, vector<1x128xf32>
    %58 = arith.mulf %47, %56 : vector<1x128xf32>
    %59 = arith.subf %57, %58 : vector<1x128xf32>
    %60 = vector.broadcast %56 : vector<1x128xf32> to vector<32x128xf32>
    %61 = arith.mulf %40, %60 : vector<32x128xf32>
    %62 = vector.broadcast %59 : vector<1x128xf32> to vector<32x128xf32>
    %63 = arith.addf %61, %62 : vector<32x128xf32>
    %cst_52 = arith.constant 5.000000e-01 : f32
    %64 = vector.broadcast %cst_52 : f32 to vector<32x128xf32>
    %65 = arith.mulf %64, %63 : vector<32x128xf32>
    %cst_53 = arith.constant 0.707106769 : f32
    %66 = vector.broadcast %cst_53 : f32 to vector<32x128xf32>
    %67 = arith.mulf %63, %66 : vector<32x128xf32>
    %68 = math.erf %67 : vector<32x128xf32>
    %cst_54 = arith.constant 1.000000e+00 : f32
    %69 = vector.broadcast %cst_54 : f32 to vector<32x128xf32>
    %70 = arith.addf %69, %68 : vector<32x128xf32>
    %71 = arith.mulf %65, %70 : vector<32x128xf32>
    %cst_55 = arith.constant 0.000000e+00 : f32
    %72 = vector.broadcast %cst_55 : f32 to vector<2x18x128xf32>
    %c0_56 = arith.constant 0 : index
    %c0_57 = arith.constant 0 : index
    %c0_58 = arith.constant 0 : index
    %73 = vector.load %arg8[%c0_56, %c0_57, %c0_58] : memref<2x18x128xf32, #tpu.memory_space<vmem>>, vector<2x18x128xf32>
    tpu.vector_store %arg8[%c0_56, %c0_57, %c0_58], %72 {strides = array<i32>} : memref<2x18x128xf32, #tpu.memory_space<vmem>>, vector<2x18x128xf32>,
    %74 = vector.shape_cast %71 : vector<32x128xf32> to vector<2x16x128xf32>
    %c0_59 = arith.constant 0 : index
    %c1_60 = arith.constant 1 : index
    %c0_61 = arith.constant 0 : index
    %75 = vector.load %arg8[%c0_59, %c1_60, %c0_61] : memref<2x18x128xf32, #tpu.memory_space<vmem>>, vector<2x16x128xf32>
    tpu.vector_store %arg8[%c0_59, %c1_60, %c0_61], %74 {strides = array<i32>} : memref<2x18x128xf32, #tpu.memory_space<vmem>>, vector<2x16x128xf32>,
    %cst_62 = arith.constant 0.000000e+00 : f32
    %76 = vector.broadcast %cst_62 : f32 to vector<32x128xf32>
    %c0_63 = arith.constant 0 : index
    %c0_64 = arith.constant 0 : index
    %c0_65 = arith.constant 0 : index
    %77 = vector.load %arg8[%c0_63, %c0_64, %c0_65] : memref<2x18x128xf32, #tpu.memory_space<vmem>>, vector<2x16x128xf32>
    %78 = vector.shape_cast %77 : vector<2x16x128xf32> to vector<32x128xf32>
    %79 = arith.truncf %78 : vector<32x128xf32> to vector<32x128xbf16>
    %c0_66 = arith.constant 0 : index
    %c0_67 = arith.constant 0 : index
    %c0_68 = arith.constant 0 : index
    %80 = vector.load %arg3[%c0_66, %c0_67, %c0_68] : memref<3x128x128xbf16, #tpu.memory_space<vmem>>, vector<1x128x128xbf16>
    %81 = vector.shape_cast %80 : vector<1x128x128xbf16> to vector<128x128xbf16>
    %cst_69 = arith.constant dense<0.000000e+00> : vector<32x128xf32>
    %82 = tpu.matmul %79, %81, %cst_69 {dimension_numbers = #tpu.dot_dimension_numbers<[1], [0], [0], [1], [0, 0, 1, 1], [], []>} : vector<32x128xbf16>, vector<128x128xbf16>, vector<32x128xf32> -> vector<32x128xf32>
    %83 = arith.addf %76, %82 : vector<32x128xf32>
    %c0_70 = arith.constant 0 : index
    %c1_71 = arith.constant 1 : index
    %c0_72 = arith.constant 0 : index
    %84 = vector.load %arg8[%c0_70, %c1_71, %c0_72] : memref<2x18x128xf32, #tpu.memory_space<vmem>>, vector<2x16x128xf32>
    %85 = vector.shape_cast %84 : vector<2x16x128xf32> to vector<32x128xf32>
    %86 = arith.truncf %85 : vector<32x128xf32> to vector<32x128xbf16>
    %c1_73 = arith.constant 1 : index
    %c0_74 = arith.constant 0 : index
    %c0_75 = arith.constant 0 : index
    %87 = vector.load %arg3[%c1_73, %c0_74, %c0_75] : memref<3x128x128xbf16, #tpu.memory_space<vmem>>, vector<1x128x128xbf16>
    %88 = vector.shape_cast %87 : vector<1x128x128xbf16> to vector<128x128xbf16>
    %cst_76 = arith.constant dense<0.000000e+00> : vector<32x128xf32>
    %89 = tpu.matmul %86, %88, %cst_76 {dimension_numbers = #tpu.dot_dimension_numbers<[1], [0], [0], [1], [0, 0, 1, 1], [], []>} : vector<32x128xbf16>, vector<128x128xbf16>, vector<32x128xf32> -> vector<32x128xf32>
    %90 = arith.addf %83, %89 : vector<32x128xf32>
    %c0_77 = arith.constant 0 : index
    %c2_78 = arith.constant 2 : index
    %c0_79 = arith.constant 0 : index
    %91 = vector.load %arg8[%c0_77, %c2_78, %c0_79] : memref<2x18x128xf32, #tpu.memory_space<vmem>>, vector<2x16x128xf32>
    %92 = vector.shape_cast %91 : vector<2x16x128xf32> to vector<32x128xf32>
    %93 = arith.truncf %92 : vector<32x128xf32> to vector<32x128xbf16>
    %c2_80 = arith.constant 2 : index
    %c0_81 = arith.constant 0 : index
    %c0_82 = arith.constant 0 : index
    %94 = vector.load %arg3[%c2_80, %c0_81, %c0_82] : memref<3x128x128xbf16, #tpu.memory_space<vmem>>, vector<1x128x128xbf16>
    %95 = vector.shape_cast %94 : vector<1x128x128xbf16> to vector<128x128xbf16>
    %cst_83 = arith.constant dense<0.000000e+00> : vector<32x128xf32>
    %96 = tpu.matmul %93, %95, %cst_83 {dimension_numbers = #tpu.dot_dimension_numbers<[1], [0], [0], [1], [0, 0, 1, 1], [], []>} : vector<32x128xbf16>, vector<128x128xbf16>, vector<32x128xf32> -> vector<32x128xf32>
    %97 = arith.addf %90, %96 : vector<32x128xf32>
    %cst_84 = arith.constant dense<0.000000e+00> : vector<128xf32>
    %98 = vector.multi_reduction <add>, %97, %cst_84 [0] : vector<32x128xf32> to vector<128xf32>
    %99 = vector.shape_cast %98 : vector<128xf32> to vector<1x128xf32>
    %100 = arith.mulf %97, %97 : vector<32x128xf32>
    %cst_85 = arith.constant dense<0.000000e+00> : vector<128xf32>
    %101 = vector.multi_reduction <add>, %100, %cst_85 [0] : vector<32x128xf32> to vector<128xf32>
    %102 = vector.shape_cast %101 : vector<128xf32> to vector<1x128xf32>
    %c0_86 = arith.constant 0 : index
    %c0_87 = arith.constant 0 : index
    %103 = vector.load %arg5[%c0_86, %c0_87] : memref<128x128xf32, #tpu.memory_space<vmem>>, vector<128x128xf32>
    %cst_88 = arith.constant dense<0.000000e+00> : vector<1x128xf32>
    %104 = tpu.matmul %99, %103, %cst_88 {dimension_numbers = #tpu.dot_dimension_numbers<[1], [0], [0], [1], [0, 0, 1, 1], [], []>} : vector<1x128xf32>, vector<128x128xf32>, vector<1x128xf32> -> vector<1x128xf32>
    %c0_89 = arith.constant 0 : index
    %c0_90 = arith.constant 0 : index
    %105 = vector.load %arg5[%c0_89, %c0_90] : memref<128x128xf32, #tpu.memory_space<vmem>>, vector<128x128xf32>
    %cst_91 = arith.constant dense<0.000000e+00> : vector<1x128xf32>
    %106 = tpu.matmul %102, %105, %cst_91 {dimension_numbers = #tpu.dot_dimension_numbers<[1], [0], [0], [1], [0, 0, 1, 1], [], []>} : vector<1x128xf32>, vector<128x128xf32>, vector<1x128xf32> -> vector<1x128xf32>
    %107 = arith.mulf %104, %104 : vector<1x128xf32>
    %108 = arith.subf %106, %107 : vector<1x128xf32>
    %c2_92 = arith.constant 2 : index
    %c0_93 = arith.constant 0 : index
    %109 = vector.load %arg4[%c2_92, %c0_93] : memref<4x128xf32, #tpu.memory_space<vmem>>, vector<1x128xf32>
    %cst_94 = arith.constant 9.99999974E-6 : f32
    %110 = vector.broadcast %cst_94 : f32 to vector<1x128xf32>
    %111 = arith.addf %108, %110 : vector<1x128xf32>
    %112 = math.rsqrt %111 : vector<1x128xf32>
    %113 = arith.mulf %109, %112 : vector<1x128xf32>
    %c3_95 = arith.constant 3 : index
    %c0_96 = arith.constant 0 : index
    %114 = vector.load %arg4[%c3_95, %c0_96] : memref<4x128xf32, #tpu.memory_space<vmem>>, vector<1x128xf32>
    %115 = arith.mulf %104, %113 : vector<1x128xf32>
    %116 = arith.subf %114, %115 : vector<1x128xf32>
    %117 = vector.broadcast %113 : vector<1x128xf32> to vector<32x128xf32>
    %118 = arith.mulf %97, %117 : vector<32x128xf32>
    %119 = vector.broadcast %116 : vector<1x128xf32> to vector<32x128xf32>
    %120 = arith.addf %118, %119 : vector<32x128xf32>
    %cst_97 = arith.constant 5.000000e-01 : f32
    %121 = vector.broadcast %cst_97 : f32 to vector<32x128xf32>
    %122 = arith.mulf %121, %120 : vector<32x128xf32>
    %cst_98 = arith.constant 0.707106769 : f32
    %123 = vector.broadcast %cst_98 : f32 to vector<32x128xf32>
    %124 = arith.mulf %120, %123 : vector<32x128xf32>
    %125 = math.erf %124 : vector<32x128xf32>
    %cst_99 = arith.constant 1.000000e+00 : f32
    %126 = vector.broadcast %cst_99 : f32 to vector<32x128xf32>
    %127 = arith.addf %126, %125 : vector<32x128xf32>
    %128 = arith.mulf %122, %127 : vector<32x128xf32>
    %129 = arith.addf %128, %0 : vector<32x128xf32>
    %c0_100 = arith.constant 0 : index
    %c0_101 = arith.constant 0 : index
    %130 = vector.load %arg6[%c0_100, %c0_101] : memref<32x128xf32, #tpu.memory_space<vmem>>, vector<32x128xf32>
    tpu.vector_store %arg6[%c0_100, %c0_101], %129 {strides = array<i32>} : memref<32x128xf32, #tpu.memory_space<vmem>>, vector<32x128xf32>,
    return
  }
  func.func @transform_0(%arg0: i32) -> (i32, i32) {
    %c0_i32 = arith.constant 0 : i32
    %c0_i32_0 = arith.constant 0 : i32
    %c0_i32_1 = arith.constant 0 : i32
    return %c0_i32, %c0_i32_0 : i32, i32
  }
  func.func @transform_1(%arg0: i32) -> (i32, i32, i32) {
    %c0_i32 = arith.constant 0 : i32
    %c0_i32_0 = arith.constant 0 : i32
    %c0_i32_1 = arith.constant 0 : i32
    %c0_i32_2 = arith.constant 0 : i32
    return %c0_i32, %c0_i32_0, %c0_i32_1 : i32, i32, i32
  }
  func.func @transform_2(%arg0: i32) -> (i32, i32, i32) {
    %c0_i32 = arith.constant 0 : i32
    %c0_i32_0 = arith.constant 0 : i32
    %c0_i32_1 = arith.constant 0 : i32
    %c0_i32_2 = arith.constant 0 : i32
    return %c0_i32, %c0_i32_0, %c0_i32_1 : i32, i32, i32
  }
  func.func @transform_3(%arg0: i32) -> (i32, i32) {
    %c0_i32 = arith.constant 0 : i32
    %c0_i32_0 = arith.constant 0 : i32
    %c0_i32_1 = arith.constant 0 : i32
    return %c0_i32, %c0_i32_0 : i32, i32
  }
  func.func @transform_4(%arg0: i32) -> (i32, i32) {
    %c0_i32 = arith.constant 0 : i32
    %c0_i32_0 = arith.constant 0 : i32
    %c0_i32_1 = arith.constant 0 : i32
    return %c0_i32, %c0_i32_0 : i32, i32
  }
  func.func @transform_5(%arg0: i32) -> (i32, i32) {
    %c0_i32 = arith.constant 0 : i32
    %c0_i32_0 = arith.constant 0 : i32
    %c0_i32_1 = arith.constant 0 : i32
    return %c0_i32, %c0_i32_0 : i32, i32
  }
}

</mosaic_0001>

<bundles_post_ra>
// kernel: deterministic_forward.1
= control target key start
LH: loop header
LB: loop body
LE: loop exit
PB: predicated region body
PF: predicated region fallthrough
CT: control target
= control target key end

     0   :  { %v2175_v1 = vmov 0.0   ;;  %vm2176_vm0 = vmmov 0   ;;  %s2705_s1 = inlined_call_operand.vmem [shape: bf16[5,128,128], index: 1, kind: input, shape index: {}]   ;;  %s2706_s0 = inlined_call_operand.vmem [shape: f32[32,128], index: 0, kind: input, shape index: {}]   ;;  %s2707_s4 = inlined_call_operand.vmem [shape: f32[128,128], index: 4, kind: input, shape index: {}]   ;;  %s2708_s2 = inlined_call_operand.vmem [shape: bf16[3,128,128], index: 2, kind: input, shape index: {}]   ;;  %s2709_s3 = inlined_call_operand.vmem [shape: f32[4,128], index: 3, kind: input, shape index: {}]   ;;  %s2710_s5 = inlined_call_operand.vmem [shape: f32[32,128], index: 5, kind: output, shape index: {}]  }
   0x1   :  { %v2087_v0 = vld [vmem:[%s2705_s1 + $0x78] sm:$0xff]   ;;  %25 = vst [vmem:[#allocation2] sm:$0xff] %v2175_v1  ;;  %26 = vst [vmem:[#allocation2 + $0x8] sm:$0xff] %v2175_v1  ;;  %v2089_v3 = vld [vmem:[%s2705_s1 + $0x70] sm:$0xff]  }
   0x2   :  { %27 = vst [vmem:[#allocation2 + $0x10] sm:$0xf] %v2175_v1  ;;  %28 = vst [vmem:[#allocation2 + $0x18] sm:$0xff] %v2175_v1  ;;  %v2088_v2 = vld [vmem:[%s2705_s1 + $0x38] sm:$0xff]   ;;  %1785 = vmatprep.subr.bf16.mxu0 %v2087_v0  ;;  %v2090_v4 = vld [vmem:[%s2705_s1 + $0x30] sm:$0xff]  }
   0x3   :  { %29 = vst [vmem:[#allocation2 + $0x20] sm:$0xff] %v2175_v1  ;;  %30 = vst [vmem:[#allocation2 + $0x28] sm:$0xf] %v2175_v1  ;;  %1805 = vmatprep.subr.bf16.mxu1 %v2088_v2  ;;  %1786 = vmatpush3.bf16.msra.mxu0 %v2087_v0  ;;  %v2091_v5 = vld [vmem:[%s2705_s1 + $0x68] sm:$0xff]   ;;  %v2093_v7 = vld [vmem:[%s2705_s1 + $0x60] sm:$0xff]  }
   0x4   :  { %869 = vst [vmem:[#allocation3] sm:$0xff] %v2175_v1  ;;  %870 = vst [vmem:[#allocation3 + $0x8] sm:$0xff] %v2175_v1  ;;  %1806 = vmatpush3.bf16.msra.mxu1 %v2088_v2  ;;  %1787 = vmatprep.subr.bf16.mxu0 %v2089_v3  ;;  %v2092_v6 = vld [vmem:[%s2705_s1 + $0x28] sm:$0xff]   ;;  %v2094_v8 = vld [vmem:[%s2705_s1 + $0x20] sm:$0xff]  }
   0x5   :  { %871 = vst [vmem:[#allocation3 + $0x10] sm:$0x3] %v2175_v1  ;;  %872 = vst [vmem:[#allocation3 + $0x18] sm:$0xff] %v2175_v1  ;;  %1807 = vmatprep.subr.bf16.mxu1 %v2090_v4  ;;  %v2095_v9 = vld [vmem:[%s2705_s1 + $0x58] sm:$0xff]   ;;  %v2097_v11 = vld [vmem:[%s2705_s1 + $0x50] sm:$0xff]  }
   0x6   :  { %873 = vst [vmem:[#allocation3 + $0x20] sm:$0xff] %v2175_v1  ;;  %874 = vst [vmem:[#allocation3 + $0x28] sm:$0x3] %v2175_v1  ;;  %v2096_v10 = vld [vmem:[%s2705_s1 + $0x18] sm:$0xff]   ;;  %v2098_v12 = vld [vmem:[%s2705_s1 + $0x10] sm:$0xff]  }
   0x7   :  { %1788 = vmatpush3.bf16.msra.mxu0 %v2089_v3  ;;  %v21_v13 = vld [vmem:[%s2706_s0] sm:$0xff]  ;;  %v22_v14 = vld [vmem:[%s2706_s0 + $0x8] sm:$0xff]  ;;  %v2264_v15 = vld [vmem:[%s2706_s0 + $0x10] sm:$0xff] }
   0x8   :  { %1808 = vmatpush3.bf16.msra.mxu1 %v2090_v4  ;;  %1789 = vmatprep.subr.bf16.mxu0 %v2091_v5  ;;  %31 = vst [vmem:[#allocation2 + $0x2] sm:$0xff] %v21_v13  ;;  %32 = vst [vmem:[#allocation2 + $0xa] sm:$0xff] %v22_v14  ;;  %v2269_v16 = vld [vmem:[%s2706_s0 + $0x18] sm:$0xff]  ;;  %v2099_v17 = vld [vmem:[%s2705_s1 + $0x48] sm:$0xff]   ;;  %v278_v37 = vpack.c.bf16 %v22_v14, %v21_v13 }
   0x9   :  { %1809 = vmatprep.subr.bf16.mxu1 %v2092_v6  ;;  %33 = vst [vmem:[#allocation2 + $0x1a] sm:$0xff] %v2264_v15  ;;  %34 = vst [vmem:[#allocation2 + $0x22] sm:$0xff] %v2269_v16  ;;  %v2100_v18 = vld [vmem:[%s2705_s1 + $0x8] sm:$0xff]   ;;  %v2101_v19 = vld [vmem:[%s2705_s1 + $0x40] sm:$0xff]   ;;  %v279_v58 = vpack.c.bf16 %v2269_v16, %v2264_v15 }
   0xa   :  { %v2102_v23 = vld [vmem:[%s2705_s1] sm:$0xff]   ;;  %v2103_v29 = vld [vmem:[%s2705_s1 + $0xb8] sm:$0xff]   ;;  %v2105_v35 = vld [vmem:[%s2705_s1 + $0xb0] sm:$0xff]  }
   0xb   :  { %1790 = vmatpush3.bf16.msra.mxu0 %v2091_v5  ;;  %v2104_v32 = vld [vmem:[%s2705_s1 + $0xf8] sm:$0xff]   ;;  %v2106_v36 = vld [vmem:[%s2705_s1 + $0xf0] sm:$0xff]   ;;  %v2107_v38 = vld [vmem:[%s2705_s1 + $0xa8] sm:$0xff]  }
   0xc   :  { %1810 = vmatpush3.bf16.msra.mxu1 %v2092_v6  ;;  %1791 = vmatprep.subr.bf16.mxu0 %v2093_v7  ;;  %v2108_v39 = vld [vmem:[%s2705_s1 + $0xe8] sm:$0xff]   ;;  %v2109_v43 = vld [vmem:[%s2705_s1 + $0xa0] sm:$0xff]   ;;  %v2111_v45 = vld [vmem:[%s2705_s1 + $0x98] sm:$0xff]  }
   0xd   :  { %1811 = vmatprep.subr.bf16.mxu1 %v2094_v8  ;;  %v2110_v44 = vld [vmem:[%s2705_s1 + $0xe0] sm:$0xff]   ;;  %v2112_v46 = vld [vmem:[%s2705_s1 + $0xd8] sm:$0xff]   ;;  %v2113_v47 = vld [vmem:[%s2705_s1 + $0x90] sm:$0xff]  }
   0xe   :  { %v2114_v48 = vld [vmem:[%s2705_s1 + $0xd0] sm:$0xff]   ;;  %v2115_v49 = vld [vmem:[%s2705_s1 + $0x88] sm:$0xff]   ;;  %v2117_v51 = vld [vmem:[%s2705_s1 + $0x80] sm:$0xff]  }
   0xf   :  { %1792 = vmatpush3.bf16.msra.mxu0 %v2093_v7  ;;  %v57_v20 = vld [vmem:[#allocation2 + $0x1] sm:$0xff]  ;;  %v58_v21 = vld [vmem:[#allocation2 + $0x9] sm:$0xff]  ;;  %v2119_v53 = vld [vmem:[%s2705_s1 + $0x138] sm:$0xff]  }
  0x10   :  { %1812 = vmatpush3.bf16.msra.mxu1 %v2094_v8  ;;  %1793 = vmatprep.subr.bf16.mxu0 %v2095_v9  ;;  %v35_v22 = vld [vmem:[#allocation2] sm:$0xff]  ;;  %v61_v24 = vpack.c.bf16 %v58_v21, %v57_v20  ;;  %v36_v25 = vld [vmem:[#allocation2 + $0x8] sm:$0xff]  ;;  %v37_v30 = vld [vmem:[#allocation2 + $0x18] sm:$0xff] }
  0x11   :  { %1813 = vmatprep.subr.bf16.mxu1 %v2096_v10  ;;  %v39_v26 = vpack.c.bf16 %v36_v25, %v35_v22  ;;  %v59_v27 = vld [vmem:[#allocation2 + $0x19] sm:$0xff]  ;;  %v60_v28 = vld [vmem:[#allocation2 + $0x21] sm:$0xff]  ;;  %v399_v41 = vld [vmem:[#allocation2 + $0xb] sm:$0xff] }
  0x12   :  { %1801 = vmatprep.mubr.bf16.mxu0 %v61_v24  ;;  %v38_v31 = vld [vmem:[#allocation2 + $0x20] sm:$0xff]  ;;  %v62_v33 = vpack.c.bf16 %v60_v28, %v59_v27  ;;  %v2116_v50 = vld [vmem:[%s2705_s1 + $0xc8] sm:$0xff]   ;;  %v2120_v60 = vld [vmem:[%s2705_s1 + $0x130] sm:$0xff]  }
  0x13   :  { %1794 = vmatpush3.bf16.msra.mxu0 %v2095_v9  ;;  %1821 = vmatprep.mubr.bf16.mxu1 %v39_v26  ;;  %v40_v34 = vpack.c.bf16 %v38_v31, %v37_v30  ;;  %v398_v40 = vld [vmem:[#allocation2 + $0x3] sm:$0xff]  ;;  %v400_v54 = vld [vmem:[#allocation2 + $0x1b] sm:$0xff]  ;;  %v523_v57 = vld [vmem:[#allocation2 + $0xc] sm:$0xff] }
  0x14   :  { %1814 = vmatpush3.bf16.msra.mxu1 %v2096_v10  ;;  %1795 = vmatprep.subr.bf16.mxu0 %v2097_v11  ;;  %v402_v42 = vpack.c.bf16 %v399_v41, %v398_v40  ;;  %v2118_v52 = vld [vmem:[%s2705_s1 + $0xc0] sm:$0xff]   ;;  %v2121_v62 = vld [vmem:[%s2705_s1 + $0x128] sm:$0xff]   ;;  %v2123_v0 = vld [vmem:[%s2705_s1 + $0x118] sm:$0xff]  }
  0x15   :  { %1815 = vmatprep.subr.bf16.mxu1 %v2098_v12  ;;  %v401_v55 = vld [vmem:[#allocation2 + $0x23] sm:$0xff]  ;;  %v2124_v2 = vld [vmem:[%s2705_s1 + $0x110] sm:$0xff]   ;;  %v2364_v8 = vld [vmem:[%s2707_s4 + $0x78] sm:$0xff] }
  0x16   :  { %v522_v56 = vld [vmem:[#allocation2 + $0x4] sm:$0xff]  ;;  %v403_v59 = vpack.c.bf16 %v401_v55, %v400_v54  ;;  %v524_v5 = vld [vmem:[#allocation2 + $0x1c] sm:$0xff]  ;;  %v2369_v9 = vld [vmem:[%s2707_s4 + $0x70] sm:$0xff] }
  0x17   :  { %1796 = vmatpush3.bf16.msra.mxu0 %v2097_v11  ;;  %v526_v61 = vpack.c.bf16 %v523_v57, %v522_v56  ;;  %v2122_v63 = vld [vmem:[%s2705_s1 + $0x120] sm:$0xff]   ;;  %v2125_v3 = vld [vmem:[%s2705_s1 + $0x108] sm:$0xff]   ;;  %v2408_v13 = vld [vmem:[%s2707_s4 + $0x50] sm:$0xff] }
  0x18   :  { %1816 = vmatpush3.bf16.msra.mxu1 %v2098_v12  ;;  %1797 = vmatprep.subr.bf16.mxu0 %v2099_v17  ;;  %v2126_v4 = vld [vmem:[%s2705_s1 + $0x100] sm:$0xff]   ;;  %v2382_v10 = vld [vmem:[%s2707_s4 + $0x68] sm:$0xff]  ;;  %v2399_v12 = vld [vmem:[%s2707_s4 + $0x58] sm:$0xff] }
  0x19   :  { %1817 = vmatprep.subr.bf16.mxu1 %v2100_v18  ;;  %v525_v6 = vld [vmem:[#allocation2 + $0x24] sm:$0xff]  ;;  %v2435_v16 = vld [vmem:[%s2707_s4 + $0x38] sm:$0xff]  ;;  %v2477_v21 = vld [vmem:[%s2707_s4 + $0x10] sm:$0xff] }
  0x1a   :  { %v527_v7 = vpack.c.bf16 %v525_v6, %v524_v5  ;;  %v2390_v11 = vld [vmem:[%s2707_s4 + $0x60] sm:$0xff]  ;;  %v2417_v14 = vld [vmem:[%s2707_s4 + $0x48] sm:$0xff]  ;;  %v2468_v20 = vld [vmem:[%s2707_s4 + $0x18] sm:$0xff] }
  0x1b   :  { %1798 = vmatpush3.bf16.msra.mxu0 %v2099_v17  ;;  %v2426_v15 = vld [vmem:[%s2707_s4 + $0x40] sm:$0xff]  ;;  %v2444_v17 = vld [vmem:[%s2707_s4 + $0x30] sm:$0xff]  ;;  %v2486_v22 = vld [vmem:[%s2707_s4 + $0x8] sm:$0xff] }
  0x1c   :  { %1818 = vmatpush3.bf16.msra.mxu1 %v2100_v18  ;;  %1799 = vmatprep.subr.bf16.mxu0 %v2101_v19  ;;  %v2453_v18 = vld [vmem:[%s2707_s4 + $0x28] sm:$0xff] }
  0x1d   :  { %1819 = vmatprep.subr.bf16.mxu1 %v2102_v23 }
  0x1f   :  { %1800 = vmatpush3.bf16.msra.mxu0 %v2101_v19  ;;  %v2460_v19 = vld [vmem:[%s2707_s4 + $0x20] sm:$0xff] }
  0x20   :  { %1820 = vmatpush3.bf16.msra.mxu1 %v2102_v23  ;;  %1825 = vmatprep.subr.bf16.mxu0 %v2103_v29  ;;  %v2495_v23 = vld [vmem:[%s2707_s4] sm:$0xff] }
  0x21   :  { %1845 = vmatprep.subr.bf16.mxu1 %v2104_v32 }
  0x22   :  { %1802 = vmatmul.mubr.bf16.vlgmr.msra.gmra.mxu0 %v62_v33 }
  0x23   :  { %1822 = vmatmul.mubr.bf16.vlgmr.msra.gmra.mxu1 %v40_v34  ;;  %1826 = vmatpush3.bf16.msra.mxu0 %v2103_v29 }
  0x24   :  { %1846 = vmatpush3.bf16.msra.mxu1 %v2104_v32  ;;  %1827 = vmatprep.subr.bf16.mxu0 %v2105_v35 }
  0x25   :  { %1847 = vmatprep.subr.bf16.mxu1 %v2106_v36  ;;  %1841 = vmatprep.mubr.bf16.mxu0 %v278_v37 }
  0x26   :  { %1861 = vmatprep.mubr.bf16.mxu1 %v402_v42 }
  0x27   :  { %1828 = vmatpush3.bf16.msra.mxu0 %v2105_v35 }
  0x28   :  { %1848 = vmatpush3.bf16.msra.mxu1 %v2106_v36  ;;  %1829 = vmatprep.subr.bf16.mxu0 %v2107_v38 }
  0x29   :  { %1849 = vmatprep.subr.bf16.mxu1 %v2108_v39 }
  0x2b   :  { %1830 = vmatpush3.bf16.msra.mxu0 %v2107_v38 }
  0x2c   :  { %1850 = vmatpush3.bf16.msra.mxu1 %v2108_v39  ;;  %1831 = vmatprep.subr.bf16.mxu0 %v2109_v43 }
  0x2d   :  { %1851 = vmatprep.subr.bf16.mxu1 %v2110_v44 }
  0x2f   :  { %1832 = vmatpush3.bf16.msra.mxu0 %v2109_v43 }
  0x30   :  { %1852 = vmatpush3.bf16.msra.mxu1 %v2110_v44  ;;  %1833 = vmatprep.subr.bf16.mxu0 %v2111_v45 }
  0x31   :  { %1853 = vmatprep.subr.bf16.mxu1 %v2112_v46 }
  0x33   :  { %1834 = vmatpush3.bf16.msra.mxu0 %v2111_v45 }
  0x34   :  { %1854 = vmatpush3.bf16.msra.mxu1 %v2112_v46  ;;  %1835 = vmatprep.subr.bf16.mxu0 %v2113_v47 }
  0x35   :  { %1855 = vmatprep.subr.bf16.mxu1 %v2114_v48 }
  0x37   :  { %1836 = vmatpush3.bf16.msra.mxu0 %v2113_v47 }
  0x38   :  { %1856 = vmatpush3.bf16.msra.mxu1 %v2114_v48  ;;  %1837 = vmatprep.subr.bf16.mxu0 %v2115_v49 }
  0x39   :  { %1857 = vmatprep.subr.bf16.mxu1 %v2116_v50 }
  0x3b   :  { %1838 = vmatpush3.bf16.msra.mxu0 %v2115_v49 }
  0x3c   :  { %1858 = vmatpush3.bf16.msra.mxu1 %v2116_v50  ;;  %1839 = vmatprep.subr.bf16.mxu0 %v2117_v51 }
  0x3d   :  { %1859 = vmatprep.subr.bf16.mxu1 %v2118_v52 }
  0x3f   :  { %1840 = vmatpush3.bf16.msra.mxu0 %v2117_v51 }
  0x40   :  { %1860 = vmatpush3.bf16.msra.mxu1 %v2118_v52  ;;  %1865 = vmatprep.subr.bf16.mxu0 %v2119_v53 }
  0x41   :  { %1885 = vmatprep.subr.mxu1 %v2175_v1 }
  0x42   :  { %1842 = vmatmul.mubr.bf16.vlgmr.msra.gmra.mxu0 %v279_v58 }
  0x43   :  { %1866 = vmatpush3.bf16.msra.mxu0 %v2119_v53  ;;  %1862 = vmatmul.mubr.bf16.vlgmr.msra.gmra.mxu1 %v403_v59 }
  0x44   :  { %1867 = vmatprep.subr.bf16.mxu0 %v2120_v60  ;;  %1881 = vmatprep.mubr.bf16.mxu0 %v526_v61 }
  0x45   :  { %1886 = vmatpush3.msra.mxu1 %v2364_v8  ;;  %1917 = vmatprep.mubr.msk.f32.mxu1 %vm2176_vm0, %v2175_v1 }
  0x46   :  { %1887 = vmatprep.subr.mxu1 %v2175_v1 }
  0x47   :  { %1868 = vmatpush3.bf16.msra.mxu0 %v2120_v60  ;;  %1888 = vmatpush3.msra.mxu1 %v2369_v9 }
  0x48   :  { %1869 = vmatprep.subr.bf16.mxu0 %v2121_v62  ;;  %1889 = vmatprep.subr.mxu1 %v2175_v1 }
  0x49   :  { %1890 = vmatpush3.msra.mxu1 %v2382_v10 }
  0x4a   :  { %1891 = vmatprep.subr.mxu1 %v2175_v1 }
  0x4b   :  { %1870 = vmatpush3.bf16.msra.mxu0 %v2121_v62  ;;  %1892 = vmatpush3.msra.mxu1 %v2390_v11 }
  0x4c   :  { %1871 = vmatprep.subr.bf16.mxu0 %v2122_v63  ;;  %1893 = vmatprep.subr.mxu1 %v2175_v1 }
  0x4d   :  { %1894 = vmatpush3.msra.mxu1 %v2399_v12 }
  0x4e   :  { %1895 = vmatprep.subr.mxu1 %v2175_v1 }
  0x4f   :  { %1872 = vmatpush3.bf16.msra.mxu0 %v2122_v63  ;;  %1896 = vmatpush3.msra.mxu1 %v2408_v13 }
  0x50   :  { %1873 = vmatprep.subr.bf16.mxu0 %v2123_v0  ;;  %1897 = vmatprep.subr.mxu1 %v2175_v1 }
  0x51   :  { %1898 = vmatpush3.msra.mxu1 %v2417_v14 }
  0x52   :  { %1899 = vmatprep.subr.mxu1 %v2175_v1 }
  0x53   :  { %1874 = vmatpush3.bf16.msra.mxu0 %v2123_v0  ;;  %1900 = vmatpush3.msra.mxu1 %v2426_v15 }
  0x54   :  { %1875 = vmatprep.subr.bf16.mxu0 %v2124_v2  ;;  %1901 = vmatprep.subr.mxu1 %v2175_v1 }
  0x55   :  { %1902 = vmatpush3.msra.mxu1 %v2435_v16 }
  0x56   :  { %1903 = vmatprep.subr.mxu1 %v2175_v1 }
  0x57   :  { %1876 = vmatpush3.bf16.msra.mxu0 %v2124_v2  ;;  %1904 = vmatpush3.msra.mxu1 %v2444_v17 }
  0x58   :  { %1877 = vmatprep.subr.bf16.mxu0 %v2125_v3  ;;  %1905 = vmatprep.subr.mxu1 %v2175_v1 }
  0x59   :  { %1906 = vmatpush3.msra.mxu1 %v2453_v18 }
  0x5a   :  { %1907 = vmatprep.subr.mxu1 %v2175_v1 }
  0x5b   :  { %1878 = vmatpush3.bf16.msra.mxu0 %v2125_v3  ;;  %1908 = vmatpush3.msra.mxu1 %v2460_v19 }
  0x5c   :  { %1879 = vmatprep.subr.bf16.mxu0 %v2126_v4  ;;  %1909 = vmatprep.subr.mxu1 %v2175_v1 }
  0x5d   :  { %1910 = vmatpush3.msra.mxu1 %v2468_v20 }
  0x5e   :  { %1911 = vmatprep.subr.mxu1 %v2175_v1 }
  0x5f   :  { %1880 = vmatpush3.bf16.msra.mxu0 %v2126_v4  ;;  %1912 = vmatpush3.msra.mxu1 %v2477_v21 }
  0x60   :  { %1920 = vmatprep.subr.mxu0 %v2175_v1  ;;  %1913 = vmatprep.subr.mxu1 %v2175_v1 }
  0x61   :  { %1914 = vmatpush3.msra.mxu1 %v2486_v22 }
  0x62   :  { %1882 = vmatmul.mubr.bf16.vlgmr.msra.gmra.mxu0 %v527_v7  ;;  %1915 = vmatprep.subr.mxu1 %v2175_v1 }
  0x63   :  { %1921 = vmatpush3.msra.mxu0 %v2364_v8  ;;  %1916 = vmatpush3.msra.mxu1 %v2495_v23 }
  0x64   :  { %1922 = vmatprep.subr.mxu0 %v2175_v1  ;;  %1952 = vmatprep.mubr.msk.f32.mxu0 %vm2176_vm0, %v2175_v1 }
  0x65   :  { %1923 = vmatpush3.msra.mxu0 %v2369_v9 }
  0x66   :  { %1924 = vmatprep.subr.mxu0 %v2175_v1 }
  0x67   :  { %1925 = vmatpush3.msra.mxu0 %v2382_v10 }
  0x68   :  { %1926 = vmatprep.subr.mxu0 %v2175_v1 }
  0x69   :  { %1927 = vmatpush3.msra.mxu0 %v2390_v11 }
  0x6a   :  { %1928 = vmatprep.subr.mxu0 %v2175_v1 }
  0x6b   :  { %1929 = vmatpush3.msra.mxu0 %v2399_v12 }
  0x6c   :  { %1930 = vmatprep.subr.mxu0 %v2175_v1 }
  0x6d   :  { %1931 = vmatpush3.msra.mxu0 %v2408_v13 }
  0x6e   :  { %1932 = vmatprep.subr.mxu0 %v2175_v1 }
  0x6f   :  { %1933 = vmatpush3.msra.mxu0 %v2417_v14 }
  0x70   :  { %1934 = vmatprep.subr.mxu0 %v2175_v1 }
  0x71   :  { %1935 = vmatpush3.msra.mxu0 %v2426_v15 }
  0x72   :  { %1936 = vmatprep.subr.mxu0 %v2175_v1 }
  0x73   :  { %1937 = vmatpush3.msra.mxu0 %v2435_v16 }
  0x74   :  { %1938 = vmatprep.subr.mxu0 %v2175_v1 }
  0x75   :  { %1939 = vmatpush3.msra.mxu0 %v2444_v17 }
  0x76   :  { %1940 = vmatprep.subr.mxu0 %v2175_v1 }
  0x77   :  { %1941 = vmatpush3.msra.mxu0 %v2453_v18 }
  0x78   :  { %1942 = vmatprep.subr.mxu0 %v2175_v1 }
  0x79   :  { %1943 = vmatpush3.msra.mxu0 %v2460_v19 }
  0x7a   :  { %1944 = vmatprep.subr.mxu0 %v2175_v1 }
  0x7b   :  { %1945 = vmatpush3.msra.mxu0 %v2468_v20 }
  0x7c   :  { %1946 = vmatprep.subr.mxu0 %v2175_v1 }
  0x7d   :  { %1947 = vmatpush3.msra.mxu0 %v2477_v21 }
  0x7e   :  { %1948 = vmatprep.subr.mxu0 %v2175_v1 }
  0x7f   :  { %1949 = vmatpush3.msra.mxu0 %v2486_v22 }
  0x80   :  { %1950 = vmatprep.subr.mxu0 %v2175_v1 }
  0x81   :  { %1951 = vmatpush3.msra.mxu0 %v2495_v23 }
  0xe2   :  { %v1803_v24 = vpop.f32.mrf.mxu0 }
  0xe3   :  { %v1823_v25 = vpop.f32.mrf.mxu1 }
  0xe4   :  { %v162_v26 = vpop.f32.mrf.mxu0  ;;  %v268_v40 = vadd.f32 %v1823_v25, %v1803_v24 }
  0xe5   :  { %v259_v27 = vpop.f32.mrf.mxu1 }
  0xe6   :  { %v1804_v28 = vpop.f32.mrf.mxu0  ;;  %v260_v37 = vadd.f32 %v259_v27, %v162_v26 }
  0xe7   :  { %v1824_v29 = vpop.f32.mrf.mxu1 }
  0xe8   :  { %v165_v30 = vpop.f32.mrf.mxu0  ;;  %v271_v44 = vadd.f32 %v1824_v29, %v1804_v28 }
  0xe9   :  { %v262_v32 = vpop.f32.mrf.mxu1 }
  0xea   :  { %v263_v41 = vadd.f32 %v262_v32, %v165_v30 }
 0x102   :  { %v1843_v31 = vpop.f32.mrf.mxu0 }
 0x103   :  { %v1863_v34 = vpop.f32.mrf.mxu1  ;;  %v396_v45 = vadd.f32 %v1843_v31, %v268_v40  ;;  %v2130_v40 = vld [vmem:[%s2708_s2 + $0x30] sm:$0xff]  }
 0x104   :  { %v379_v33 = vpop.f32.mrf.mxu0 }
 0x105   :  { %v503_v36 = vpop.f32.mrf.mxu1  ;;  %v394_v42 = vadd.f32 %v379_v33, %v260_v37  ;;  %v520_v52 = vadd.f32 %v1863_v34, %v396_v45  ;;  %v2131_v37 = vld [vmem:[%s2708_s2 + $0x68] sm:$0xff]  }
 0x106   :  { %v1844_v35 = vpop.f32.mrf.mxu0  ;;  %v2139_v45 = vld [vmem:[%s2708_s2 + $0x48] sm:$0xff]  }
 0x107   :  { %v1864_v39 = vpop.f32.mrf.mxu1  ;;  %v397_v49 = vadd.f32 %v1844_v35, %v271_v44  ;;  %v518_v50 = vadd.f32 %v503_v36, %v394_v42  ;;  %v2127_v35 = vld [vmem:[%s2708_s2 + $0x78] sm:$0xff]   ;;  %v2129_v36 = vld [vmem:[%s2708_s2 + $0x70] sm:$0xff]   ;;  %v2132_v42 = vld [vmem:[%s2708_s2 + $0x28] sm:$0xff]  }
 0x108   :  { %v382_v38 = vpop.f32.mrf.mxu0  ;;  %1955 = vmatprep.subr.bf16.mxu1 %v2127_v35  ;;  %v2134_v44 = vld [vmem:[%s2708_s2 + $0x20] sm:$0xff]  }
 0x109   :  { %v395_v46 = vadd.f32 %v382_v38, %v263_v41  ;;  %v506_v47 = vpop.f32.mrf.mxu1  ;;  %v521_v56 = vadd.f32 %v1864_v39, %v397_v49  ;;  %v2128_v38 = vld [vmem:[%s2708_s2 + $0x38] sm:$0xff]   ;;  %v2133_v39 = vld [vmem:[%s2708_s2 + $0x60] sm:$0xff]   ;;  %v2140_v49 = vld [vmem:[%s2708_s2 + $0x8] sm:$0xff]  }
 0x10a   :  { %1975 = vmatprep.subr.bf16.mxu0 %v2128_v38  ;;  %v2135_v41 = vld [vmem:[%s2708_s2 + $0x58] sm:$0xff]  }
 0x10b   :  { %v519_v53 = vadd.f32 %v506_v47, %v395_v46  ;;  %v2136_v46 = vld [vmem:[%s2708_s2 + $0x18] sm:$0xff]   ;;  %v2141_v47 = vld [vmem:[%s2708_s2 + $0x40] sm:$0xff]  }
 0x122   :  { %v1883_v43 = vpop.f32.mrf.mxu0 }
 0x123   :  { %v2509_v57 = vadd.f32 %v1883_v43, %v520_v52  ;;  %v2137_v43 = vld [vmem:[%s2708_s2 + $0x50] sm:$0xff]  }
 0x124   :  { %v627_v48 = vpop.f32.mrf.mxu0 }
 0x125   :  { %v2507_v54 = vadd.f32 %v627_v48, %v518_v50  ;;  %v657_v63 = vmul.f32 %v2509_v57, %v2509_v57  ;;  %v2138_v48 = vld [vmem:[%s2708_s2 + $0x10] sm:$0xff]   ;;  %v2575_v50 = vld [vmem:[%s2708_s2 + $0xb8] sm:$0xff]  }
 0x126   :  { %v1884_v51 = vpop.f32.mrf.mxu0 }
 0x127   :  { %v655_v59 = vmul.f32 %v2507_v54, %v2507_v54  ;;  %v2515_v60 = vadd.f32 %v1884_v51, %v521_v56  ;;  %v2142_v51 = vld [vmem:[%s2708_s2] sm:$0xff]  }
 0x128   :  { %v630_v55 = vpop.f32.mrf.mxu0 }
 0x129   :  { %v2511_v58 = vadd.f32 %v630_v55, %v519_v53  ;;  %v658_v3 = vmul.f32 %v2515_v60, %v2515_v60 }
 0x12b   :  { %v646_v61 = vadd.f32 %v2511_v58, %v2507_v54  ;;  %v656_v62 = vmul.f32 %v2511_v58, %v2511_v58 }
 0x12d   :  { %v647_v0 = vadd.f32 %v646_v61, %v2509_v57  ;;  %v659_v2 = vadd.f32 %v656_v62, %v655_v59 }
 0x12f   :  { %v648_v4 = vadd.f32 %v647_v0, %v2515_v60  ;;  %v660_v5 = vadd.f32 %v659_v2, %v657_v63  ;;  %v833_v63 = vlaneseq  ;;  %v826_v2 = vld [vmem:[%s2709_s3] sm:$0x1] }
 0x131   :  { %v649_v6 = vrot.slane %v648_v4, 4  ;;  %v661_v7 = vadd.f32 %v660_v5, %v658_v3  ;;  %v834_v0 = vshrl.u32 %v833_v63, 7 }
 0x133   :  { %v650_v24 = vadd.f32 %v649_v6, %v648_v4  ;;  %v662_v25 = vrot.slane %v661_v7, 4  ;;  %v2585_v3 = vsub.s32 0, %v834_v0  ;;  %v830_v6 = vld [vmem:[%s2709_s3 + $0x1] sm:$0x1] }
 0x135   :  { %v651_v26 = vrot.slane %v650_v24, 2  ;;  %v663_v27 = vadd.f32 %v662_v25, %v661_v7 }
 0x137   :  { %v652_v28 = vadd.f32 %v651_v26, %v650_v24  ;;  %v664_v29 = vrot.slane %v663_v27, 2 }
 0x139   :  { %v653_v30 = vrot.slane %v652_v28, 1  ;;  %v665_v31 = vadd.f32 %v664_v29, %v663_v27 }
 0x13b   :  { %v654_v32 = vadd.f32 %v653_v30, %v652_v28  ;;  %v666_v33 = vrot.slane %v665_v31, 1 }
 0x13d   :  { %1918 = vmatmul.mubr.f32.vlgmr.msra.gmra.mxu1 %v654_v32  ;;  %v667_v34 = vadd.f32 %v666_v33, %v665_v31 }
 0x13e   :  { %1956 = vmatpush3.bf16.msra.mxu1 %v2127_v35 }
 0x13f   :  { %1953 = vmatmul.mubr.f32.vlgmr.msra.gmra.mxu0 %v667_v34  ;;  %1957 = vmatprep.subr.bf16.mxu1 %v2129_v36 }
 0x140   :  { %1976 = vmatpush3.bf16.msra.mxu0 %v2128_v38 }
 0x141   :  { %1977 = vmatprep.subr.bf16.mxu0 %v2130_v40 }
 0x142   :  { %1958 = vmatpush3.bf16.msra.mxu1 %v2129_v36 }
 0x143   :  { %1959 = vmatprep.subr.bf16.mxu1 %v2131_v37 }
 0x144   :  { %1978 = vmatpush3.bf16.msra.mxu0 %v2130_v40 }
 0x145   :  { %1979 = vmatprep.subr.bf16.mxu0 %v2132_v42 }
 0x146   :  { %1960 = vmatpush3.bf16.msra.mxu1 %v2131_v37 }
 0x147   :  { %1961 = vmatprep.subr.bf16.mxu1 %v2133_v39 }
 0x148   :  { %1980 = vmatpush3.bf16.msra.mxu0 %v2132_v42 }
 0x149   :  { %1981 = vmatprep.subr.bf16.mxu0 %v2134_v44 }
 0x14a   :  { %1962 = vmatpush3.bf16.msra.mxu1 %v2133_v39 }
 0x14b   :  { %1963 = vmatprep.subr.bf16.mxu1 %v2135_v41 }
 0x14c   :  { %1982 = vmatpush3.bf16.msra.mxu0 %v2134_v44 }
 0x14d   :  { %1983 = vmatprep.subr.bf16.mxu0 %v2136_v46 }
 0x14e   :  { %1964 = vmatpush3.bf16.msra.mxu1 %v2135_v41 }
 0x14f   :  { %1965 = vmatprep.subr.bf16.mxu1 %v2137_v43 }
 0x150   :  { %1984 = vmatpush3.bf16.msra.mxu0 %v2136_v46 }
 0x151   :  { %1985 = vmatprep.subr.bf16.mxu0 %v2138_v48 }
 0x152   :  { %1966 = vmatpush3.bf16.msra.mxu1 %v2137_v43 }
 0x153   :  { %1967 = vmatprep.subr.bf16.mxu1 %v2139_v45 }
 0x154   :  { %1986 = vmatpush3.bf16.msra.mxu0 %v2138_v48 }
 0x155   :  { %1987 = vmatprep.subr.bf16.mxu0 %v2140_v49 }
 0x156   :  { %1968 = vmatpush3.bf16.msra.mxu1 %v2139_v45 }
 0x157   :  { %1969 = vmatprep.subr.bf16.mxu1 %v2141_v47 }
 0x158   :  { %1988 = vmatpush3.bf16.msra.mxu0 %v2140_v49 }
 0x159   :  { %1989 = vmatprep.subr.bf16.mxu0 %v2142_v51 }
 0x15a   :  { %1970 = vmatpush3.bf16.msra.mxu1 %v2141_v47 }
 0x15b   :  { %1995 = vmatprep.subr.bf16.mxu1 %v2575_v50 }
 0x15c   :  { %1990 = vmatpush3.bf16.msra.mxu0 %v2142_v51 }
 0x15d   :  { %2015 = vmatprep.subr.mxu0 %v2175_v1 }
 0x1fd   :  { %v750_v52 = vpop.f32.mrf.mxu1 }
 0x1fe   :  { %v824_v53 = vmul.f32 %v750_v52, %v750_v52 }
 0x1ff   :  { %v1919_v55 = vpop.f32.mrf.mxu1  ;;  %v820_v56 = vpop.f32.mrf.mxu0 }
 0x200   :  { %v825_v59 = vsub.f32 %v820_v56, %v824_v53  ;;  %v2144_v55 = vld [vmem:[%s2708_s2 + $0xb0] sm:$0xff]  }
 0x201   :  { %v1954_v61 = vpop.f32.mrf.mxu0 }
 0x202   :  { %v827_v62 = vadd.f32 1e-05, %v825_v59  ;;  %v2145_v59 = vld [vmem:[%s2708_s2 + $0xa8] sm:$0xff]  }
 0x204   :  { %2151 = vrsqrt.f32 %v827_v62 }
 0x211   :  { %v2152_v4 = vpop.eup %2151 }
 0x212   :  { %v829_v5 = vmul.f32 %v2152_v4, %v826_v2 }
 0x214   :  { %v831_v7 = vmul.f32 %v829_v5, %v750_v52  ;;  %v836_v24 = vrot.slane %v829_v5, %v2585_v3 }
 0x216   :  { %v832_v25 = vsub.f32 %v830_v6, %v831_v7  ;;  %v837_v26 = vmul.f32 %v836_v24, %v2507_v54  ;;  %v838_v27 = vmul.f32 %v836_v24, %v2511_v58  ;;  %v839_v28 = vmul.f32 %v836_v24, %v2509_v57  ;;  %v2147_v7 = vld [vmem:[%s2708_s2 + $0x98] sm:$0xff]  }
 0x217   :  { %v840_v29 = vmul.f32 %v836_v24, %v2515_v60  ;;  %v2148_v24 = vld [vmem:[%s2708_s2 + $0x90] sm:$0xff]  }
 0x218   :  { %v844_v30 = vrot.slane %v832_v25, %v2585_v3  ;;  %v2149_v25 = vld [vmem:[%s2708_s2 + $0x88] sm:$0xff]  }
 0x21a   :  { %v845_v31 = vadd.f32 %v844_v30, %v837_v26  ;;  %v846_v32 = vadd.f32 %v844_v30, %v838_v27  ;;  %v847_v33 = vadd.f32 %v844_v30, %v839_v28  ;;  %v848_v34 = vadd.f32 %v844_v30, %v840_v29  ;;  %v2150_v26 = vld [vmem:[%s2708_s2 + $0x80] sm:$0xff]  }
 0x21c   :  { %v853_v35 = vmul.f32 0.70710677, %v845_v31  ;;  %v854_v36 = vmul.f32 0.70710677, %v846_v32  ;;  %v855_v37 = vmul.f32 0.70710677, %v847_v33 }
 0x21d   :  { %v856_v38 = vmul.f32 0.70710677, %v848_v34  ;;  %v849_v39 = vmul.f32 0.5, %v845_v31  ;;  %v850_v60 = vmul.f32 0.5, %v846_v32  ;;  %v851_v43 = vmul.f32 0.5, %v847_v33 }
 0x21e   :  { %2153 = verf.f32 %v853_v35  ;;  %v852_v46 = vmul.f32 0.5, %v848_v34 }
 0x21f   :  { %2155 = verf.f32 %v854_v36 }
 0x220   :  { %2157 = verf.f32 %v855_v37 }
 0x221   :  { %2159 = verf.f32 %v856_v38 }
 0x22b   :  { %v2154_v54 = vpop.eup %2153 }
 0x22c   :  { %v2156_v58 = vpop.eup %2155  ;;  %v861_v57 = vadd.f32 1.0, %v2154_v54 }
 0x22d   :  { %v2158_v40 = vpop.eup %2157  ;;  %v862_v41 = vadd.f32 1.0, %v2156_v58 }
 0x22e   :  { %v2160_v42 = vpop.eup %2159  ;;  %v863_v44 = vadd.f32 1.0, %v2158_v40  ;;  %v865_v45 = vmul.f32 %v861_v57, %v849_v39 }
 0x22f   :  { %v864_v47 = vadd.f32 1.0, %v2160_v42  ;;  %v866_v48 = vmul.f32 %v862_v41, %v850_v60 }
 0x230   :  { %v867_v49 = vmul.f32 %v863_v44, %v851_v43  ;;  %875 = vst [vmem:[#allocation3 + $0x1] sm:$0xff] %v865_v45 }
 0x231   :  { %v868_v51 = vmul.f32 %v864_v47, %v852_v46  ;;  %876 = vst [vmem:[#allocation3 + $0x9] sm:$0xff] %v866_v48  ;;  %v905_v52 = vpack.c.bf16 %v866_v48, %v865_v45 }
 0x232   :  { %877 = vst [vmem:[#allocation3 + $0x19] sm:$0xff] %v867_v49 }
 0x233   :  { %878 = vst [vmem:[#allocation3 + $0x21] sm:$0xff] %v868_v51  ;;  %1971 = vmatprep.mubr.bf16.mxu1 %v905_v52  ;;  %v906_v53 = vpack.c.bf16 %v868_v51, %v867_v49 }
 0x235   :  { %1972 = vmatmul.mubr.bf16.vlgmr.msra.gmra.mxu1 %v906_v53 }
 0x236   :  { %1996 = vmatpush3.bf16.msra.mxu1 %v2575_v50  ;;  %v2146_v50 = vld [vmem:[%s2708_s2 + $0xa0] sm:$0xff]  }
 0x237   :  { %v879_v56 = vld [vmem:[#allocation3] sm:$0xff]  ;;  %1997 = vmatprep.subr.bf16.mxu1 %v2144_v55 }
 0x238   :  { %v880_v61 = vld [vmem:[#allocation3 + $0x8] sm:$0xff] }
 0x239   :  { %v1118_v62 = vld [vmem:[#allocation3 + $0x2] sm:$0xff]  ;;  %v1119_v63 = vld [vmem:[#allocation3 + $0xa] sm:$0xff]  ;;  %v883_v0 = vpack.c.bf16 %v880_v61, %v879_v56  ;;  %v881_v2 = vld [vmem:[#allocation3 + $0x18] sm:$0xff] }
 0x23a   :  { %v1122_v4 = vpack.c.bf16 %v1119_v63, %v1118_v62  ;;  %v882_v5 = vld [vmem:[#allocation3 + $0x20] sm:$0xff]  ;;  %1998 = vmatpush3.bf16.msra.mxu1 %v2144_v55  ;;  %v1422_v63 = vld [vmem:[%s2709_s3 + $0x2] sm:$0x1] }
 0x23b   :  { %1991 = vmatprep.mubr.bf16.mxu0 %v883_v0  ;;  %v884_v6 = vpack.c.bf16 %v882_v5, %v881_v2  ;;  %1999 = vmatprep.subr.bf16.mxu1 %v2145_v59  ;;  %v1120_v27 = vld [vmem:[#allocation3 + $0x1a] sm:$0xff]  ;;  %v1121_v28 = vld [vmem:[#allocation3 + $0x22] sm:$0xff] }
 0x23c   :  { %2011 = vmatprep.mubr.bf16.mxu1 %v1122_v4  ;;  %v1123_v29 = vpack.c.bf16 %v1121_v28, %v1120_v27  ;;  %v1426_v4 = vld [vmem:[%s2709_s3 + $0x3] sm:$0x1] }
 0x23d   :  { %1992 = vmatmul.mubr.bf16.vlgmr.msra.gmra.mxu0 %v884_v6 }
 0x23e   :  { %2000 = vmatpush3.bf16.msra.mxu1 %v2145_v59  ;;  %2016 = vmatpush3.msra.mxu0 %v2364_v8 }
 0x23f   :  { %2001 = vmatprep.subr.bf16.mxu1 %v2146_v50  ;;  %2017 = vmatprep.subr.mxu0 %v2175_v1 }
 0x240   :  { %2018 = vmatpush3.msra.mxu0 %v2369_v9  ;;  %2047 = vmatprep.mubr.msk.f32.mxu0 %vm2176_vm0, %v2175_v1 }
 0x241   :  { %2019 = vmatprep.subr.mxu0 %v2175_v1 }
 0x242   :  { %2002 = vmatpush3.bf16.msra.mxu1 %v2146_v50  ;;  %2020 = vmatpush3.msra.mxu0 %v2382_v10 }
 0x243   :  { %2003 = vmatprep.subr.bf16.mxu1 %v2147_v7  ;;  %2021 = vmatprep.subr.mxu0 %v2175_v1 }
 0x244   :  { %2022 = vmatpush3.msra.mxu0 %v2390_v11 }
 0x245   :  { %2023 = vmatprep.subr.mxu0 %v2175_v1 }
 0x246   :  { %2004 = vmatpush3.bf16.msra.mxu1 %v2147_v7  ;;  %2024 = vmatpush3.msra.mxu0 %v2399_v12 }
 0x247   :  { %2005 = vmatprep.subr.bf16.mxu1 %v2148_v24  ;;  %2025 = vmatprep.subr.mxu0 %v2175_v1 }
 0x248   :  { %2026 = vmatpush3.msra.mxu0 %v2408_v13 }
 0x249   :  { %2027 = vmatprep.subr.mxu0 %v2175_v1 }
 0x24a   :  { %2006 = vmatpush3.bf16.msra.mxu1 %v2148_v24  ;;  %2028 = vmatpush3.msra.mxu0 %v2417_v14 }
 0x24b   :  { %2007 = vmatprep.subr.bf16.mxu1 %v2149_v25  ;;  %2029 = vmatprep.subr.mxu0 %v2175_v1 }
 0x24c   :  { %2030 = vmatpush3.msra.mxu0 %v2426_v15 }
 0x24d   :  { %2031 = vmatprep.subr.mxu0 %v2175_v1 }
 0x24e   :  { %2008 = vmatpush3.bf16.msra.mxu1 %v2149_v25  ;;  %2032 = vmatpush3.msra.mxu0 %v2435_v16 }
 0x24f   :  { %2009 = vmatprep.subr.bf16.mxu1 %v2150_v26  ;;  %2033 = vmatprep.subr.mxu0 %v2175_v1 }
 0x250   :  { %2034 = vmatpush3.msra.mxu0 %v2444_v17 }
 0x251   :  { %2035 = vmatprep.subr.mxu0 %v2175_v1 }
 0x252   :  { %2010 = vmatpush3.bf16.msra.mxu1 %v2150_v26  ;;  %2036 = vmatpush3.msra.mxu0 %v2453_v18 }
 0x253   :  { %2050 = vmatprep.subr.mxu1 %v2175_v1  ;;  %2037 = vmatprep.subr.mxu0 %v2175_v1 }
 0x254   :  { %2038 = vmatpush3.msra.mxu0 %v2460_v19 }
 0x255   :  { %2012 = vmatmul.mubr.bf16.vlgmr.msra.gmra.mxu1 %v1123_v29  ;;  %2039 = vmatprep.subr.mxu0 %v2175_v1 }
 0x256   :  { %2051 = vmatpush3.msra.mxu1 %v2364_v8  ;;  %2040 = vmatpush3.msra.mxu0 %v2468_v20 }
 0x257   :  { %2052 = vmatprep.subr.mxu1 %v2175_v1  ;;  %2041 = vmatprep.subr.mxu0 %v2175_v1 }
 0x258   :  { %2053 = vmatpush3.msra.mxu1 %v2369_v9  ;;  %2042 = vmatpush3.msra.mxu0 %v2477_v21 }
 0x259   :  { %2054 = vmatprep.subr.mxu1 %v2175_v1  ;;  %2043 = vmatprep.subr.mxu0 %v2175_v1 }
 0x25a   :  { %2055 = vmatpush3.msra.mxu1 %v2382_v10  ;;  %2044 = vmatpush3.msra.mxu0 %v2486_v22 }
 0x25b   :  { %2056 = vmatprep.subr.mxu1 %v2175_v1  ;;  %2045 = vmatprep.subr.mxu0 %v2175_v1 }
 0x25c   :  { %2057 = vmatpush3.msra.mxu1 %v2390_v11  ;;  %2046 = vmatpush3.msra.mxu0 %v2495_v23 }
 0x25d   :  { %2058 = vmatprep.subr.mxu1 %v2175_v1  ;;  %2082 = vmatprep.mubr.msk.f32.mxu1 %vm2176_vm0, %v2175_v1 }
 0x25e   :  { %2059 = vmatpush3.msra.mxu1 %v2399_v12 }
 0x25f   :  { %2060 = vmatprep.subr.mxu1 %v2175_v1 }
 0x260   :  { %2061 = vmatpush3.msra.mxu1 %v2408_v13 }
 0x261   :  { %2062 = vmatprep.subr.mxu1 %v2175_v1 }
 0x262   :  { %2063 = vmatpush3.msra.mxu1 %v2417_v14 }
 0x263   :  { %2064 = vmatprep.subr.mxu1 %v2175_v1 }
 0x264   :  { %2065 = vmatpush3.msra.mxu1 %v2426_v15 }
 0x265   :  { %2066 = vmatprep.subr.mxu1 %v2175_v1 }
 0x266   :  { %2067 = vmatpush3.msra.mxu1 %v2435_v16 }
 0x267   :  { %2068 = vmatprep.subr.mxu1 %v2175_v1 }
 0x268   :  { %2069 = vmatpush3.msra.mxu1 %v2444_v17 }
 0x269   :  { %2070 = vmatprep.subr.mxu1 %v2175_v1 }
 0x26a   :  { %2071 = vmatpush3.msra.mxu1 %v2453_v18 }
 0x26b   :  { %2072 = vmatprep.subr.mxu1 %v2175_v1 }
 0x26c   :  { %2073 = vmatpush3.msra.mxu1 %v2460_v19 }
 0x26d   :  { %2074 = vmatprep.subr.mxu1 %v2175_v1 }
 0x26e   :  { %2075 = vmatpush3.msra.mxu1 %v2468_v20 }
 0x26f   :  { %2076 = vmatprep.subr.mxu1 %v2175_v1 }
 0x270   :  { %2077 = vmatpush3.msra.mxu1 %v2477_v21 }
 0x271   :  { %2078 = vmatprep.subr.mxu1 %v2175_v1 }
 0x272   :  { %2079 = vmatpush3.msra.mxu1 %v2486_v22 }
 0x273   :  { %2080 = vmatprep.subr.mxu1 %v2175_v1 }
 0x274   :  { %2081 = vmatpush3.msra.mxu1 %v2495_v23 }
 0x2f5   :  { %v1973_v8 = vpop.f32.mrf.mxu1 }
 0x2f7   :  { %v1006_v10 = vpop.f32.mrf.mxu1 }
 0x2f9   :  { %v1974_v12 = vpop.f32.mrf.mxu1 }
 0x2fb   :  { %v1009_v14 = vpop.f32.mrf.mxu1 }
 0x2fd   :  { %v1993_v9 = vpop.f32.mrf.mxu0 }
 0x2fe   :  { %v1112_v20 = vadd.f32 %v1993_v9, %v1973_v8 }
 0x2ff   :  { %v1103_v11 = vpop.f32.mrf.mxu0 }
 0x300   :  { %v1104_v18 = vadd.f32 %v1103_v11, %v1006_v10 }
 0x301   :  { %v1994_v13 = vpop.f32.mrf.mxu0 }
 0x302   :  { %v1115_v31 = vadd.f32 %v1994_v13, %v1974_v12 }
 0x303   :  { %v1106_v16 = vpop.f32.mrf.mxu0 }
 0x304   :  { %v1107_v21 = vadd.f32 %v1106_v16, %v1009_v14 }
 0x315   :  { %v2013_v15 = vpop.f32.mrf.mxu1 }
 0x316   :  { %v1240_v1 = vadd.f32 %v2013_v15, %v1112_v20 }
 0x317   :  { %v1223_v17 = vpop.f32.mrf.mxu1 }
 0x318   :  { %v1238_v30 = vadd.f32 %v1223_v17, %v1104_v18  ;;  %v1253_v36 = vmul.f32 %v1240_v1, %v1240_v1 }
 0x319   :  { %v2014_v19 = vpop.f32.mrf.mxu1 }
 0x31a   :  { %v1251_v23 = vmul.f32 %v1238_v30, %v1238_v30  ;;  %v1241_v33 = vadd.f32 %v2014_v19, %v1115_v31 }
 0x31b   :  { %v1226_v22 = vpop.f32.mrf.mxu1 }
 0x31c   :  { %v1239_v32 = vadd.f32 %v1226_v22, %v1107_v21  ;;  %v1254_v54 = vmul.f32 %v1241_v33, %v1241_v33 }
 0x31e   :  { %v1242_v34 = vadd.f32 %v1239_v32, %v1238_v30  ;;  %v1252_v35 = vmul.f32 %v1239_v32, %v1239_v32 }
 0x320   :  { %v1243_v37 = vadd.f32 %v1242_v34, %v1240_v1  ;;  %v1255_v38 = vadd.f32 %v1252_v35, %v1251_v23 }
 0x322   :  { %v1244_v58 = vadd.f32 %v1243_v37, %v1241_v33  ;;  %v1256_v39 = vadd.f32 %v1255_v38, %v1253_v36  ;;  %v2172_v36 = vld [vmem:[#allocation2 + $0xa] sm:$0xff]  ;;  %v2173_v38 = vld [vmem:[#allocation2 + $0x1a] sm:$0xff] }
 0x324   :  { %v1245_v57 = vrot.slane %v1244_v58, 4  ;;  %v1257_v40 = vadd.f32 %v1256_v39, %v1254_v54 }
 0x326   :  { %v1246_v60 = vadd.f32 %v1245_v57, %v1244_v58  ;;  %v1258_v41 = vrot.slane %v1257_v40, 4  ;;  %v2174_v58 = vld [vmem:[#allocation2 + $0x22] sm:$0xff] }
 0x328   :  { %v1247_v42 = vrot.slane %v1246_v60, 2  ;;  %v1259_v43 = vadd.f32 %v1258_v41, %v1257_v40 }
 0x32a   :  { %v1248_v44 = vadd.f32 %v1247_v42, %v1246_v60  ;;  %v1260_v45 = vrot.slane %v1259_v43, 2 }
 0x32c   :  { %v1249_v46 = vrot.slane %v1248_v44, 1  ;;  %v1261_v47 = vadd.f32 %v1260_v45, %v1259_v43 }
 0x32e   :  { %v1250_v48 = vadd.f32 %v1249_v46, %v1248_v44  ;;  %v1262_v49 = vrot.slane %v1261_v47, 1 }
 0x330   :  { %2048 = vmatmul.mubr.f32.vlgmr.msra.gmra.mxu0 %v1250_v48  ;;  %v1263_v51 = vadd.f32 %v1262_v49, %v1261_v47 }
 0x332   :  { %2083 = vmatmul.mubr.f32.vlgmr.msra.gmra.mxu1 %v1263_v51 }
 0x3f0   :  { %v1346_v52 = vpop.f32.mrf.mxu0 }
 0x3f1   :  { %v1420_v53 = vmul.f32 %v1346_v52, %v1346_v52 }
 0x3f2   :  { %v2049_v55 = vpop.f32.mrf.mxu0  ;;  %v1416_v56 = vpop.f32.mrf.mxu1 }
 0x3f3   :  { %v1421_v59 = vsub.f32 %v1416_v56, %v1420_v53 }
 0x3f4   :  { %v2084_v61 = vpop.f32.mrf.mxu1 }
 0x3f5   :  { %v1423_v62 = vadd.f32 1e-05, %v1421_v59 }
 0x3f7   :  { %2161 = vrsqrt.f32 %v1423_v62 }
 0x404   :  { %v2162_v0 = vpop.eup %2161 }
 0x405   :  { %v1425_v2 = vmul.f32 %v2162_v0, %v1422_v63 }
 0x407   :  { %v1427_v5 = vmul.f32 %v1425_v2, %v1346_v52  ;;  %v1432_v6 = vrot.slane %v1425_v2, %v2585_v3 }
 0x409   :  { %v1428_v50 = vsub.f32 %v1426_v4, %v1427_v5  ;;  %v1433_v7 = vmul.f32 %v1432_v6, %v1238_v30  ;;  %v1434_v24 = vmul.f32 %v1432_v6, %v1239_v32  ;;  %v1435_v25 = vmul.f32 %v1432_v6, %v1240_v1 }
 0x40a   :  { %v1436_v26 = vmul.f32 %v1432_v6, %v1241_v33  ;;  %v2171_v33 = vld [vmem:[#allocation2 + $0x2] sm:$0xff] }
 0x40b   :  { %v1440_v27 = vrot.slane %v1428_v50, %v2585_v3 }
 0x40d   :  { %v1441_v28 = vadd.f32 %v1440_v27, %v1433_v7  ;;  %v1442_v29 = vadd.f32 %v1440_v27, %v1434_v24  ;;  %v1443_v8 = vadd.f32 %v1440_v27, %v1435_v25  ;;  %v1444_v9 = vadd.f32 %v1440_v27, %v1436_v26 }
 0x40f   :  { %v1449_v10 = vmul.f32 0.70710677, %v1441_v28  ;;  %v1450_v11 = vmul.f32 0.70710677, %v1442_v29  ;;  %v1451_v12 = vmul.f32 0.70710677, %v1443_v8 }
 0x410   :  { %v1452_v13 = vmul.f32 0.70710677, %v1444_v9  ;;  %v1445_v16 = vmul.f32 0.5, %v1441_v28  ;;  %v1446_v19 = vmul.f32 0.5, %v1442_v29  ;;  %v1447_v21 = vmul.f32 0.5, %v1443_v8 }
 0x411   :  { %2163 = verf.f32 %v1449_v10  ;;  %v1448_v31 = vmul.f32 0.5, %v1444_v9 }
 0x412   :  { %2165 = verf.f32 %v1450_v11 }
 0x413   :  { %2167 = verf.f32 %v1451_v12 }
 0x414   :  { %2169 = verf.f32 %v1452_v13 }
 0x41e   :  { %v2164_v14 = vpop.eup %2163 }
 0x41f   :  { %v2166_v15 = vpop.eup %2165  ;;  %v1457_v17 = vadd.f32 1.0, %v2164_v14 }
 0x420   :  { %v2168_v18 = vpop.eup %2167  ;;  %v1458_v20 = vadd.f32 1.0, %v2166_v15 }
 0x421   :  { %v2170_v3 = vpop.eup %2169  ;;  %v1459_v30 = vadd.f32 1.0, %v2168_v18  ;;  %v1461_v22 = vmul.f32 %v1457_v17, %v1445_v16 }
 0x422   :  { %v1460_v1 = vadd.f32 1.0, %v2170_v3  ;;  %v1462_v32 = vmul.f32 %v1458_v20, %v1446_v19 }
 0x423   :  { %v1463_v23 = vmul.f32 %v1459_v30, %v1447_v21  ;;  %v1465_v34 = vadd.f32 %v2171_v33, %v1461_v22 }
 0x424   :  { %v1464_v35 = vmul.f32 %v1460_v1, %v1448_v31  ;;  %v1466_v37 = vadd.f32 %v2172_v36, %v1462_v32 }
 0x425   :  { %v1467_v54 = vadd.f32 %v2173_v38, %v1463_v23  ;;  %1469 = vst [vmem:[%s2710_s5] sm:$0xff] %v1465_v34 }
 0x426   :  { %v1468_v39 = vadd.f32 %v2174_v58, %v1464_v35  ;;  %1470 = vst [vmem:[%s2710_s5 + $0x8] sm:$0xff] %v1466_v37 }
 0x427   :  { %1471 = vst [vmem:[%s2710_s5 + $0x10] sm:$0xff] %v1467_v54 }
 0x428   :  { %1472 = vst [vmem:[%s2710_s5 + $0x18] sm:$0xff] %v1468_v39 }

</bundles_post_ra>
